<compile_context>
chip_gen: v5e
topology: v5e:2x2
jax: 0.10.0
libtpu: 0.0.40
codegen_flags: <defaults>
</compile_context>

<pallas_src>
import functools
import math

import jax
import jax.numpy as jnp
from jax import lax
from jax.experimental import pallas as pl
from jax.experimental.pallas import tpu as pltpu


# ----------------------------------------------------------------------------
# Fused kernel: one grid step == `bb` batch elements.
#   in:  q, k, v   (bb, S, D)
#        w_qkv     (D, 3D)   [Wq*scale | Wk | Wv], already (in, out)
#        b_qkv     (1, 3D)   [bq*scale | bk | bv]
#        w_o       (D, D)    output projection, already (in, out)
#        b_o       (1, D)
#   out: o         (bb, S, D)
# ----------------------------------------------------------------------------
def _fused_mha_kernel(q_ref, k_ref, v_ref,
                      wqkv_ref, bqkv_ref, wo_ref, bo_ref,
                      o_ref, *, n_head):
    bb, S, D = q_ref.shape
    dh = D // n_head
    rows = bb * S

    def mxu(a, b, dims):
        # f32 operands, f32 accumulation (latency-bound at these shapes;
        # bf16 casts would only add VPU work).
        return lax.dot_general(a, b, dimension_numbers=(dims, ((), ())),
                               preferred_element_type=jnp.float32)

    # --- fused Q/K/V projection: one MXU push/pop over stacked rows --------
    x = jnp.concatenate(
        [q_ref[...].reshape(rows, D),
         k_ref[...].reshape(rows, D),
         v_ref[...].reshape(rows, D)], axis=0)                 # (3*rows, D)
    proj = mxu(x, wqkv_ref[...], ((1,), (0,))) + bqkv_ref[...]  # (3*rows, 3D)
    qp = proj[0 * rows:1 * rows, 0 * D:1 * D]   # 1/sqrt(dh) already folded in
    kp = proj[1 * rows:2 * rows, 1 * D:2 * D]
    vp = proj[2 * rows:3 * rows, 2 * D:3 * D]

    # --- per-(batch, head) attention; everything stays in vregs ------------
    merged_rows = []
    for b in range(bb):
        r0 = b * S
        heads = []
        for h in range(n_head):
            lo = h * dh
            qh = qp[r0:r0 + S, lo:lo + dh]
            kh = kp[r0:r0 + S, lo:lo + dh]
            vh = vp[r0:r0 + S, lo:lo + dh]

            # scores = qh @ kh^T (contract last dims -> no materialized k.T)
            s = mxu(qh, kh, ((1,), (1,)))                      # (S, S), f32
            m = jnp.max(s, axis=-1, keepdims=True)
            p = jnp.exp(s - m)                                 # f32 softmax
            l = jnp.sum(p, axis=-1, keepdims=True)
            attn = p * pl.reciprocal(l, approx=True)           # EUP slot

            heads.append(mxu(attn, vh, ((1,), (0,))))          # (S, dh)
        # register-resident head merge (no VMEM scratch, no masked stores)
        merged_rows.append(jnp.concatenate(heads, axis=-1))    # (S, D)

    merged = merged_rows[0] if bb == 1 else jnp.concatenate(merged_rows, axis=0)

    # --- output projection --------------------------------------------------
    out = mxu(merged, wo_ref[...], ((1,), (0,))) + bo_ref[...]  # (rows, D)
    o_ref[...] = out.reshape(bb, S, D).astype(o_ref.dtype)


# ----------------------------------------------------------------------------
# One-time parameter preparation (hoisted out of the per-call hot path):
# transpose nn.Linear weights to (in, out), fold 1/sqrt(dh) into Wq/bq, and
# concatenate Q/K/V weights & biases.
# ----------------------------------------------------------------------------
def prepare_params(params, n_head):
    D = params["w_q_w"].shape[0]
    assert D % n_head == 0
    scale = 1.0 / math.sqrt(D // n_head)

    w_qkv = jnp.concatenate([params["w_q_w"].T * scale,
                             params["w_k_w"].T,
                             params["w_v_w"].T], axis=1)            # (D, 3D)
    b_qkv = jnp.concatenate([params["w_q_b"] * scale,
                             params["w_k_b"],
                             params["w_v_b"]]).reshape(1, 3 * D)    # (1, 3D)
    return {
        "w_qkv": jax.device_put(w_qkv),
        "b_qkv": jax.device_put(b_qkv),
        "w_o": jax.device_put(params["lin_w"].T),                   # (D, D)
        "b_o": jax.device_put(params["lin_b"].reshape(1, D)),       # (1, D)
    }


# ----------------------------------------------------------------------------
# Wrapper: mirrors MultiHeadAttention.forward(q, k, v, mask=None).
#   batch_block=1  -> grid=(B,) "parallel"  (v7x: one batch element per TC)
#   batch_block=B  -> grid=(1,) single step (v5e/v6e: single TC, less overhead)
# ----------------------------------------------------------------------------
def multi_head_attention(prepped, q, k, v, n_head, *, batch_block=1):
    B, S, D = q.shape
    assert D % n_head == 0
    assert B % batch_block == 0
    bb = batch_block

    kern = functools.partial(_fused_mha_kernel, n_head=n_head)

    act_spec = pl.BlockSpec((bb, S, D), lambda i: (i, 0, 0))
    wqkv_spec = pl.BlockSpec((D, 3 * D), lambda i: (0, 0))   # resident
    bqkv_spec = pl.BlockSpec((1, 3 * D), lambda i: (0, 0))
    wo_spec = pl.BlockSpec((D, D), lambda i: (0, 0))
    bo_spec = pl.BlockSpec((1, D), lambda i: (0, 0))

    return pl.pallas_call(
        kern,
        out_shape=jax.ShapeDtypeStruct((B, S, D), jnp.float32),
        grid=(B // bb,),
        in_specs=[act_spec, act_spec, act_spec,
                  wqkv_spec, bqkv_spec, wo_spec, bo_spec],
        out_specs=pl.BlockSpec((bb, S, D), lambda i: (i, 0, 0)),
        compiler_params=pltpu.CompilerParams(
            dimension_semantics=("parallel",)),
    )(q, k, v, prepped["w_qkv"], prepped["b_qkv"],
      prepped["w_o"], prepped["b_o"])


# ----------------------------------------------------------------------------
# Pure-JAX reference for correctness.
# ----------------------------------------------------------------------------
def reference_mha(params, q, k, v, n_head):
    B, S, D = q.shape
    dh = D // n_head

    def lin(x, w, b):
        return x @ w.T + b

    qp = lin(q, params["w_q_w"], params["w_q_b"])
    kp = lin(k, params["w_k_w"], params["w_k_b"])
    vp = lin(v, params["w_v_w"], params["w_v_b"])

    def split(x):
        return x.reshape(B, S, n_head, dh).transpose(0, 2, 1, 3)

    qh, kh, vh = split(qp), split(kp), split(vp)
    s = jnp.einsum("bhqd,bhkd->bhqk", qh, kh) / math.sqrt(dh)
    p = jax.nn.softmax(s, axis=-1)
    out = jnp.einsum("bhqk,bhkd->bhqd", p, vh)
    out = out.transpose(0, 2, 1, 3).reshape(B, S, D)
    return lin(out, params["lin_w"], params["lin_b"])


if __name__ == "__main__":
    # Module-consistent small shapes: batch=2, seq=8, dim_vector=32, n_head=4
    B, S, D, H = 2, 8, 32, 4

    key = jax.random.PRNGKey(0)
    keys = jax.random.split(key, 12)

    def init_linear(kw, kb, fan_in):
        bound = 1.0 / math.sqrt(fan_in)
        w = jax.random.uniform(kw, (D, D), jnp.float32, -bound, bound)
        b = jax.random.uniform(kb, (D,), jnp.float32, -bound, bound)
        return w, b

    params = {}
    params["w_q_w"], params["w_q_b"] = init_linear(keys[0], keys[1], D)
    params["w_k_w"], params["w_k_b"] = init_linear(keys[2], keys[3], D)
    params["w_v_w"], params["w_v_b"] = init_linear(keys[4], keys[5], D)
    params["lin_w"], params["lin_b"] = init_linear(keys[6], keys[7], D)

    q = jax.random.normal(keys[8], (B, S, D), jnp.float32)
    k = jax.random.normal(keys[9], (B, S, D), jnp.float32)
    v = jax.random.normal(keys[10], (B, S, D), jnp.float32)

    ref = reference_mha(params, q, k, v, H)

    # One-time parameter prep (transpose/scale/concat hoisted out of hot path).
    prepped = prepare_params(params, H)

    # Batch-parallel grid (v7x: one batch element per TensorCore).
    out_bp = jax.block_until_ready(
        multi_head_attention(prepped, q, k, v, H, batch_block=1))
    assert out_bp.shape == (B, S, D)
    assert jnp.allclose(out_bp, ref, atol=2e-3, rtol=2e-3), \
        "batch-parallel mismatch vs reference"

    # Single-step collapsed grid (v5e/v6e single-TC fast path).
    out_ss = jax.block_until_ready(
        multi_head_attention(prepped, q, k, v, H, batch_block=B))
    assert out_ss.shape == (B, S, D)
    assert jnp.allclose(out_ss, ref, atol=2e-3, rtol=2e-3), \
        "single-step mismatch vs reference"

    print("KERNEL_OK")
</pallas_src>

<mosaic_0001>
module attributes {stable_mosaic.version = 11 : i64} {
  func.func @_fused_mha_kernel(%arg0: i32, %arg1: memref<1x8x32xf32, #tpu.memory_space<vmem>>, %arg2: memref<1x8x32xf32, #tpu.memory_space<vmem>>, %arg3: memref<1x8x32xf32, #tpu.memory_space<vmem>>, %arg4: memref<32x96xf32, #tpu.memory_space<vmem>>, %arg5: memref<1x96xf32, #tpu.memory_space<vmem>>, %arg6: memref<32x32xf32, #tpu.memory_space<vmem>>, %arg7: memref<1x32xf32, #tpu.memory_space<vmem>>, %arg8: memref<1x8x32xf32, #tpu.memory_space<vmem>>) attributes {dimension_semantics = [#tpu.dimension_semantics<parallel>], iteration_bounds = array<i64: 2>, scalar_prefetch = 0 : i64, scratch_operands = 0 : i64, tpu.core_type = #tpu.core_type<tc>, window_params = [{transform_indices = @transform_0, window_bounds = array<i64: 1, 8, 32>}, {transform_indices = @transform_1, window_bounds = array<i64: 1, 8, 32>}, {transform_indices = @transform_2, window_bounds = array<i64: 1, 8, 32>}, {pipeline_mode = #tpu.pipeline_mode<synchronous>, transform_indices = @transform_3, window_bounds = array<i64: 32, 96>}, {pipeline_mode = #tpu.pipeline_mode<synchronous>, transform_indices = @transform_4, window_bounds = array<i64: 1, 96>}, {pipeline_mode = #tpu.pipeline_mode<synchronous>, transform_indices = @transform_5, window_bounds = array<i64: 32, 32>}, {pipeline_mode = #tpu.pipeline_mode<synchronous>, transform_indices = @transform_6, window_bounds = array<i64: 1, 32>}, {transform_indices = @transform_7, window_bounds = array<i64: 1, 8, 32>}]} {
    %c0 = arith.constant 0 : index
    %c0_0 = arith.constant 0 : index
    %c0_1 = arith.constant 0 : index
    %0 = vector.load %arg1[%c0, %c0_0, %c0_1] : memref<1x8x32xf32, #tpu.memory_space<vmem>>, vector<1x8x32xf32>
    %1 = vector.shape_cast %0 : vector<1x8x32xf32> to vector<8x32xf32>
    %c0_2 = arith.constant 0 : index
    %c0_3 = arith.constant 0 : index
    %c0_4 = arith.constant 0 : index
    %2 = vector.load %arg2[%c0_2, %c0_3, %c0_4] : memref<1x8x32xf32, #tpu.memory_space<vmem>>, vector<1x8x32xf32>
    %3 = vector.shape_cast %2 : vector<1x8x32xf32> to vector<8x32xf32>
    %c0_5 = arith.constant 0 : index
    %c0_6 = arith.constant 0 : index
    %c0_7 = arith.constant 0 : index
    %4 = vector.load %arg3[%c0_5, %c0_6, %c0_7] : memref<1x8x32xf32, #tpu.memory_space<vmem>>, vector<1x8x32xf32>
    %5 = vector.shape_cast %4 : vector<1x8x32xf32> to vector<8x32xf32>
    %6 = tpu.concatenate %1, %3, %5 in 0 : vector<8x32xf32>, vector<8x32xf32>, vector<8x32xf32> -> vector<24x32xf32>
    %c0_8 = arith.constant 0 : index
    %c0_9 = arith.constant 0 : index
    %7 = vector.load %arg4[%c0_8, %c0_9] : memref<32x96xf32, #tpu.memory_space<vmem>>, vector<32x96xf32>
    %cst = arith.constant dense<0.000000e+00> : vector<24x96xf32>
    %8 = tpu.matmul %6, %7, %cst {dimension_numbers = #tpu.dot_dimension_numbers<[1], [0], [0], [1], [0, 0, 1, 1], [], []>} : vector<24x32xf32>, vector<32x96xf32>, vector<24x96xf32> -> vector<24x96xf32>
    %c0_10 = arith.constant 0 : index
    %c0_11 = arith.constant 0 : index
    %9 = vector.load %arg5[%c0_10, %c0_11] : memref<1x96xf32, #tpu.memory_space<vmem>>, vector<1x96xf32>
    %10 = vector.broadcast %9 : vector<1x96xf32> to vector<24x96xf32>
    %11 = arith.addf %8, %10 : vector<24x96xf32>
    %12 = vector.extract_strided_slice %11 {offsets = [0, 0], sizes = [8, 32], strides = [1, 1]} : vector<24x96xf32> to vector<8x32xf32>
    %13 = vector.extract_strided_slice %11 {offsets = [8, 32], sizes = [8, 32], strides = [1, 1]} : vector<24x96xf32> to vector<8x32xf32>
    %14 = vector.extract_strided_slice %11 {offsets = [16, 64], sizes = [8, 32], strides = [1, 1]} : vector<24x96xf32> to vector<8x32xf32>
    %15 = vector.extract_strided_slice %12 {offsets = [0, 0], sizes = [8, 8], strides = [1, 1]} : vector<8x32xf32> to vector<8x8xf32>
    %16 = vector.extract_strided_slice %13 {offsets = [0, 0], sizes = [8, 8], strides = [1, 1]} : vector<8x32xf32> to vector<8x8xf32>
    %17 = vector.extract_strided_slice %14 {offsets = [0, 0], sizes = [8, 8], strides = [1, 1]} : vector<8x32xf32> to vector<8x8xf32>
    %cst_12 = arith.constant dense<0.000000e+00> : vector<8x8xf32>
    %18 = tpu.matmul %15, %16, %cst_12 {dimension_numbers = #tpu.dot_dimension_numbers<[1], [1], [0], [0], [0, 0, 1, 0], [], []>} : vector<8x8xf32>, vector<8x8xf32>, vector<8x8xf32> -> vector<8x8xf32>
    %cst_13 = arith.constant dense<0xFF800000> : vector<8xf32>
    %19 = vector.multi_reduction <maximumf>, %18, %cst_13 [1] : vector<8x8xf32> to vector<8xf32>
    %20 = vector.shape_cast %19 : vector<8xf32> to vector<8x1xf32>
    %21 = vector.broadcast %20 : vector<8x1xf32> to vector<8x8xf32>
    %22 = arith.subf %18, %21 : vector<8x8xf32>
    %23 = math.exp %22 : vector<8x8xf32>
    %cst_14 = arith.constant dense<0.000000e+00> : vector<8xf32>
    %24 = vector.multi_reduction <add>, %23, %cst_14 [1] : vector<8x8xf32> to vector<8xf32>
    %25 = vector.shape_cast %24 : vector<8xf32> to vector<8x1xf32>
    %26 = tpu.reciprocal %25 {approx = true} : vector<8x1xf32> -> vector<8x1xf32>
    %27 = vector.broadcast %26 : vector<8x1xf32> to vector<8x8xf32>
    %28 = arith.mulf %23, %27 : vector<8x8xf32>
    %cst_15 = arith.constant dense<0.000000e+00> : vector<8x8xf32>
    %29 = tpu.matmul %28, %17, %cst_15 {dimension_numbers = #tpu.dot_dimension_numbers<[1], [0], [0], [1], [0, 0, 1, 1], [], []>} : vector<8x8xf32>, vector<8x8xf32>, vector<8x8xf32> -> vector<8x8xf32>
    %30 = vector.extract_strided_slice %12 {offsets = [0, 8], sizes = [8, 8], strides = [1, 1]} : vector<8x32xf32> to vector<8x8xf32>
    %31 = vector.extract_strided_slice %13 {offsets = [0, 8], sizes = [8, 8], strides = [1, 1]} : vector<8x32xf32> to vector<8x8xf32>
    %32 = vector.extract_strided_slice %14 {offsets = [0, 8], sizes = [8, 8], strides = [1, 1]} : vector<8x32xf32> to vector<8x8xf32>
    %cst_16 = arith.constant dense<0.000000e+00> : vector<8x8xf32>
    %33 = tpu.matmul %30, %31, %cst_16 {dimension_numbers = #tpu.dot_dimension_numbers<[1], [1], [0], [0], [0, 0, 1, 0], [], []>} : vector<8x8xf32>, vector<8x8xf32>, vector<8x8xf32> -> vector<8x8xf32>
    %cst_17 = arith.constant dense<0xFF800000> : vector<8xf32>
    %34 = vector.multi_reduction <maximumf>, %33, %cst_17 [1] : vector<8x8xf32> to vector<8xf32>
    %35 = vector.shape_cast %34 : vector<8xf32> to vector<8x1xf32>
    %36 = vector.broadcast %35 : vector<8x1xf32> to vector<8x8xf32>
    %37 = arith.subf %33, %36 : vector<8x8xf32>
    %38 = math.exp %37 : vector<8x8xf32>
    %cst_18 = arith.constant dense<0.000000e+00> : vector<8xf32>
    %39 = vector.multi_reduction <add>, %38, %cst_18 [1] : vector<8x8xf32> to vector<8xf32>
    %40 = vector.shape_cast %39 : vector<8xf32> to vector<8x1xf32>
    %41 = tpu.reciprocal %40 {approx = true} : vector<8x1xf32> -> vector<8x1xf32>
    %42 = vector.broadcast %41 : vector<8x1xf32> to vector<8x8xf32>
    %43 = arith.mulf %38, %42 : vector<8x8xf32>
    %cst_19 = arith.constant dense<0.000000e+00> : vector<8x8xf32>
    %44 = tpu.matmul %43, %32, %cst_19 {dimension_numbers = #tpu.dot_dimension_numbers<[1], [0], [0], [1], [0, 0, 1, 1], [], []>} : vector<8x8xf32>, vector<8x8xf32>, vector<8x8xf32> -> vector<8x8xf32>
    %45 = vector.extract_strided_slice %12 {offsets = [0, 16], sizes = [8, 8], strides = [1, 1]} : vector<8x32xf32> to vector<8x8xf32>
    %46 = vector.extract_strided_slice %13 {offsets = [0, 16], sizes = [8, 8], strides = [1, 1]} : vector<8x32xf32> to vector<8x8xf32>
    %47 = vector.extract_strided_slice %14 {offsets = [0, 16], sizes = [8, 8], strides = [1, 1]} : vector<8x32xf32> to vector<8x8xf32>
    %cst_20 = arith.constant dense<0.000000e+00> : vector<8x8xf32>
    %48 = tpu.matmul %45, %46, %cst_20 {dimension_numbers = #tpu.dot_dimension_numbers<[1], [1], [0], [0], [0, 0, 1, 0], [], []>} : vector<8x8xf32>, vector<8x8xf32>, vector<8x8xf32> -> vector<8x8xf32>
    %cst_21 = arith.constant dense<0xFF800000> : vector<8xf32>
    %49 = vector.multi_reduction <maximumf>, %48, %cst_21 [1] : vector<8x8xf32> to vector<8xf32>
    %50 = vector.shape_cast %49 : vector<8xf32> to vector<8x1xf32>
    %51 = vector.broadcast %50 : vector<8x1xf32> to vector<8x8xf32>
    %52 = arith.subf %48, %51 : vector<8x8xf32>
    %53 = math.exp %52 : vector<8x8xf32>
    %cst_22 = arith.constant dense<0.000000e+00> : vector<8xf32>
    %54 = vector.multi_reduction <add>, %53, %cst_22 [1] : vector<8x8xf32> to vector<8xf32>
    %55 = vector.shape_cast %54 : vector<8xf32> to vector<8x1xf32>
    %56 = tpu.reciprocal %55 {approx = true} : vector<8x1xf32> -> vector<8x1xf32>
    %57 = vector.broadcast %56 : vector<8x1xf32> to vector<8x8xf32>
    %58 = arith.mulf %53, %57 : vector<8x8xf32>
    %cst_23 = arith.constant dense<0.000000e+00> : vector<8x8xf32>
    %59 = tpu.matmul %58, %47, %cst_23 {dimension_numbers = #tpu.dot_dimension_numbers<[1], [0], [0], [1], [0, 0, 1, 1], [], []>} : vector<8x8xf32>, vector<8x8xf32>, vector<8x8xf32> -> vector<8x8xf32>
    %60 = vector.extract_strided_slice %12 {offsets = [0, 24], sizes = [8, 8], strides = [1, 1]} : vector<8x32xf32> to vector<8x8xf32>
    %61 = vector.extract_strided_slice %13 {offsets = [0, 24], sizes = [8, 8], strides = [1, 1]} : vector<8x32xf32> to vector<8x8xf32>
    %62 = vector.extract_strided_slice %14 {offsets = [0, 24], sizes = [8, 8], strides = [1, 1]} : vector<8x32xf32> to vector<8x8xf32>
    %cst_24 = arith.constant dense<0.000000e+00> : vector<8x8xf32>
    %63 = tpu.matmul %60, %61, %cst_24 {dimension_numbers = #tpu.dot_dimension_numbers<[1], [1], [0], [0], [0, 0, 1, 0], [], []>} : vector<8x8xf32>, vector<8x8xf32>, vector<8x8xf32> -> vector<8x8xf32>
    %cst_25 = arith.constant dense<0xFF800000> : vector<8xf32>
    %64 = vector.multi_reduction <maximumf>, %63, %cst_25 [1] : vector<8x8xf32> to vector<8xf32>
    %65 = vector.shape_cast %64 : vector<8xf32> to vector<8x1xf32>
    %66 = vector.broadcast %65 : vector<8x1xf32> to vector<8x8xf32>
    %67 = arith.subf %63, %66 : vector<8x8xf32>
    %68 = math.exp %67 : vector<8x8xf32>
    %cst_26 = arith.constant dense<0.000000e+00> : vector<8xf32>
    %69 = vector.multi_reduction <add>, %68, %cst_26 [1] : vector<8x8xf32> to vector<8xf32>
    %70 = vector.shape_cast %69 : vector<8xf32> to vector<8x1xf32>
    %71 = tpu.reciprocal %70 {approx = true} : vector<8x1xf32> -> vector<8x1xf32>
    %72 = vector.broadcast %71 : vector<8x1xf32> to vector<8x8xf32>
    %73 = arith.mulf %68, %72 : vector<8x8xf32>
    %cst_27 = arith.constant dense<0.000000e+00> : vector<8x8xf32>
    %74 = tpu.matmul %73, %62, %cst_27 {dimension_numbers = #tpu.dot_dimension_numbers<[1], [0], [0], [1], [0, 0, 1, 1], [], []>} : vector<8x8xf32>, vector<8x8xf32>, vector<8x8xf32> -> vector<8x8xf32>
    %75 = tpu.concatenate %29, %44, %59, %74 in 1 : vector<8x8xf32>, vector<8x8xf32>, vector<8x8xf32>, vector<8x8xf32> -> vector<8x32xf32>
    %c0_28 = arith.constant 0 : index
    %c0_29 = arith.constant 0 : index
    %76 = vector.load %arg6[%c0_28, %c0_29] : memref<32x32xf32, #tpu.memory_space<vmem>>, vector<32x32xf32>
    %cst_30 = arith.constant dense<0.000000e+00> : vector<8x32xf32>
    %77 = tpu.matmul %75, %76, %cst_30 {dimension_numbers = #tpu.dot_dimension_numbers<[1], [0], [0], [1], [0, 0, 1, 1], [], []>} : vector<8x32xf32>, vector<32x32xf32>, vector<8x32xf32> -> vector<8x32xf32>
    %c0_31 = arith.constant 0 : index
    %c0_32 = arith.constant 0 : index
    %78 = vector.load %arg7[%c0_31, %c0_32] : memref<1x32xf32, #tpu.memory_space<vmem>>, vector<1x32xf32>
    %79 = vector.broadcast %78 : vector<1x32xf32> to vector<8x32xf32>
    %80 = arith.addf %77, %79 : vector<8x32xf32>
    %81 = vector.shape_cast %80 : vector<8x32xf32> to vector<1x8x32xf32>
    %c0_33 = arith.constant 0 : index
    %c0_34 = arith.constant 0 : index
    %c0_35 = arith.constant 0 : index
    %82 = vector.load %arg8[%c0_33, %c0_34, %c0_35] : memref<1x8x32xf32, #tpu.memory_space<vmem>>, vector<1x8x32xf32>
    tpu.vector_store %arg8[%c0_33, %c0_34, %c0_35], %81 {strides = array<i32>} : memref<1x8x32xf32, #tpu.memory_space<vmem>>, vector<1x8x32xf32>,
    return
  }
  func.func @transform_0(%arg0: i32) -> (i32, i32, i32) {
    %c0_i32 = arith.constant 0 : i32
    %c0_i32_0 = arith.constant 0 : i32
    %c0_i32_1 = arith.constant 0 : i32
    return %arg0, %c0_i32, %c0_i32_0 : i32, i32, i32
  }
  func.func @transform_1(%arg0: i32) -> (i32, i32, i32) {
    %c0_i32 = arith.constant 0 : i32
    %c0_i32_0 = arith.constant 0 : i32
    %c0_i32_1 = arith.constant 0 : i32
    return %arg0, %c0_i32, %c0_i32_0 : i32, i32, i32
  }
  func.func @transform_2(%arg0: i32) -> (i32, i32, i32) {
    %c0_i32 = arith.constant 0 : i32
    %c0_i32_0 = arith.constant 0 : i32
    %c0_i32_1 = arith.constant 0 : i32
    return %arg0, %c0_i32, %c0_i32_0 : i32, i32, i32
  }
  func.func @transform_3(%arg0: i32) -> (i32, i32) {
    %c0_i32 = arith.constant 0 : i32
    %c0_i32_0 = arith.constant 0 : i32
    %c0_i32_1 = arith.constant 0 : i32
    return %c0_i32, %c0_i32_0 : i32, i32
  }
  func.func @transform_4(%arg0: i32) -> (i32, i32) {
    %c0_i32 = arith.constant 0 : i32
    %c0_i32_0 = arith.constant 0 : i32
    %c0_i32_1 = arith.constant 0 : i32
    return %c0_i32, %c0_i32_0 : i32, i32
  }
  func.func @transform_5(%arg0: i32) -> (i32, i32) {
    %c0_i32 = arith.constant 0 : i32
    %c0_i32_0 = arith.constant 0 : i32
    %c0_i32_1 = arith.constant 0 : i32
    return %c0_i32, %c0_i32_0 : i32, i32
  }
  func.func @transform_6(%arg0: i32) -> (i32, i32) {
    %c0_i32 = arith.constant 0 : i32
    %c0_i32_0 = arith.constant 0 : i32
    %c0_i32_1 = arith.constant 0 : i32
    return %c0_i32, %c0_i32_0 : i32, i32
  }
  func.func @transform_7(%arg0: i32) -> (i32, i32, i32) {
    %c0_i32 = arith.constant 0 : i32
    %c0_i32_0 = arith.constant 0 : i32
    %c0_i32_1 = arith.constant 0 : i32
    return %arg0, %c0_i32, %c0_i32_0 : i32, i32, i32
  }
}

</mosaic_0001>

<bundles_post_ra>
// kernel: tpu_custom_call.1
= control target key start
LH: loop header
LB: loop body
LE: loop exit
PB: predicated region body
PF: predicated region fallthrough
CT: control target
= control target key end

     0   :  { %s1595_s0 = inlined_call_operand.hbm [shape: f32[2,8,32], index: 0, kind: input, shape index: {}]   ;;  %s1596_s1 = inlined_call_operand.hbm [shape: f32[2,8,32], index: 1, kind: input, shape index: {}]   ;;  %s1597_s2 = inlined_call_operand.hbm [shape: f32[2,8,32], index: 2, kind: input, shape index: {}]   ;;  %s1598_s3 = inlined_call_operand.hbm [shape: f32[32,96], index: 3, kind: input, shape index: {}]   ;;  %s1599_s4 = inlined_call_operand.vmem [shape: f32[1,96], index: 4, kind: input, shape index: {}]   ;;  %s1600_s5 = inlined_call_operand.hbm [shape: f32[32,32], index: 5, kind: input, shape index: {}]   ;;  %s1601_s6 = inlined_call_operand.vmem [shape: f32[1,32], index: 6, kind: input, shape index: {}]   ;;  %s1602_s7 = inlined_call_operand.hbm [shape: f32[2,8,32], index: 7, kind: output, shape index: {}]  }
   0x1   :  { %1612 = sst [smem:[#allocation21_spill]] %s1596_s1 }
   0x2   :  { %1613 = sst [smem:[#allocation22_spill]] %s1598_s3 }
   0x3   :  { %12 = vsyncpa [#allocation3], 0 }
   0x4   :  { %14 = vsyncpa [#allocation3 + $0x1], 0 }
   0x5   :  { %15 = vsyncpa [#allocation6], 0 }
   0x6   :  { %17 = vsyncpa [#allocation6 + $0x1], 0 }
   0x7   :  { %18 = vsyncpa [#allocation9], 0 }
   0x8   :  { %19 = vsyncpa [#allocation4], 0 }
   0x9   :  { %21 = vsyncpa [#allocation4 + $0x1], 0  ;;  %s1343_s24 = smov 0   ;;  %s1345_s25 = smov 0  }
   0xa   :  { %s1347_s26 = smov 0   ;;  %s1349_s27 = smov 0  }
   0xb LB: > { %1614 = sst [smem:[#allocation16_spill]] %s1271_s24  ;;  %s1367_s8 = sadd.s32 4294967295, %s1283_s27   ;;  %s1283_s27 = sphi %s1349_s27, %s1636_s27   ;;  %s1279_s26 = sphi %s1347_s26, %s1640_s26   ;;  %s1275_s25 = sphi %s1345_s25, %s1639_s25   ;;  %s1271_s24 = sphi %s1343_s24, %s1638_s24  }
   0xc   : > { %1615 = sst [smem:[#allocation17_spill]] %s1283_s27  ;;  %p911_p0 = scmp.ge.s32.totalorder %s1283_s27, 1 }
   0xd   : > { %s1616_s3 = sld [smem:[#allocation22_spill]]  ;;  %p1611_p1 = scmp.eq.s32.totalorder %s1367_s8, 0 }
   0xe   : > { %p220_p2 = scmp.lt.s32.totalorder %s1283_s27, 3  ;;  %s1285_s10 = smov [#allocation8]  }
   0xf   : > { %s233_s11 = sshll.u32 %s1285_s10, 4  ;;  %s1603_s13 = smov 128   ;;  %s234_s11 = int_to_ptr.vmem [resolvable:$true] %s233_s11 }
  0x10   : > { %p1372_p3 = pnand %p911_p0, %p220_p2  ;;  %s1604_s14 = smov 8  }
  0x11   : > { %s910_s15 = sadd.s32 4294967294, %s1283_s27   ;;  %s1392_s16 = sadd.s32 1, %s1283_s27  }
  0x12   : > { %p964_p4 = pneg %p1372_p3  ;;  %1619 = sst [smem:[#allocation18_spill]] %s1392_s16 }
  0x13   : > { %s231_s30 = sshll.u32 %s1616_s3, 4  ;;  %s34_s17 = sadd.s32 1, %s1279_s26  ;;  %s232_s30 = int_to_ptr.hbm [resolvable:$true] %s231_s30 }
  0x14   : > { %p1381_p6 = pnand %p964_p4, %p1611_p1  ;;  %s31_s18 = ssub.s32 %s1283_s27, %s1392_s16 }
  0x15   : > { %p41_p7 = scmp.ne.s32.totalorder %s1279_s26, %s1275_s25  ;;  %p32_p8 = scmp.eq.s32.totalorder %s31_s18, 0 }
  0x16   : > { %967 = dma.hbm_to_vmem [thread:$0]  (!%p1381_p6), %s232_s30, 512, %s234_s11, [#allocation9], %s1603_s13, %s1603_s13, %s1604_s14  }
  0x17   : > { %p42_p9 = scmp.eq.s32.totalorder %s1283_s27, 0  ;;  %p47_p10 = scmp.ne.s32.totalorder %s1275_s25, %s1271_s24 }
  0x18   : > { %p207_p11 = scmp.eq.s32.totalorder %s1367_s8, 1  ;;  %p213_p2 = scmp.eq.s32.totalorder %s910_s15, 1 }
  0x19   : > { %s1404_s19 = scalar_select %p32_p8, %s1279_s26, %s34_s17  }
  0x1a   : > { %p43_p12 = por %p42_p9, %p41_p7  ;;  %p1408_p13 = por %p1611_p1, %p47_p10 }
  0x1b   : > { %1620 = sst [smem:[#allocation19_spill]] %s1404_s19  ;;  %p1412_p0 = por %p207_p11, %p41_p7 }
  0x1c   : > { %p987_p4 = scmp.lt.s32.totalorder %s1283_s27, 2  ;;  %s1605_s22 = sand.u32 1, %s1279_s26  }
  0x1d   : > { %p1418_p5 = por %p213_p2, %p47_p10  ;;  %s1424_s28 = sshll.u32 %s1605_s22, 3 }
  0x1e   : > { %s1427_s29 = sshll.u32 %s1283_s27, 3  ;;  %p1429_p8 = pnand %p987_p4, %p43_p12 }
  0x1f   : > { %s1623_s23 = scalar_select %p1418_p5, 1, 0 }
  0x20   : > { %s286_s10 = sand.u32 1, %s1283_s27   ;;  %s1626_s1 = sld [smem:[#allocation21_spill]] }
  0x21   : > { %1624 = sst [smem:[#allocation20_spill]] %s1623_s23  ;;  %s290_s18 = scalar_lea.vmem [#allocation5], %s1424_s28 }
  0x22   : > { %s298_s13 = sshll.u32 %s290_s18, 4  ;;  %s248_s19 = sshll.u32 %s1600_s5, 4  ;;  %s299_s13 = int_to_ptr.vmem [resolvable:$true] %s298_s13  ;;  %s249_s19 = int_to_ptr.hbm [resolvable:$true] %s248_s19 }
  0x23   : > { %s1442_s16 = scalar_lea.sflag [#allocation6], %s286_s10  ;;  %p1093_p9 = pneg %p1429_p8 }
  0x26   : > { %s294_s17 = scalar_lea.hbm %s1626_s1, %s1427_s29 }
  0x27   : > { %s296_s14 = sshll.u32 %s294_s17, 4  ;;  %s1096_s17 = scalar_lea.hbm %s1626_s1, 16  ;;  %s297_s14 = int_to_ptr.hbm [resolvable:$true] %s296_s14 }
  0x28   : > { %s1089_s23 = sshra.s32 %s297_s14, 4  ;;  %s1090_s23 = int_to_ptr.hbm [resolvable:$true] %s1089_s23 }
  0x29   : > { %s1091_s24 = scalar_lea.hbm %s1090_s23, 8  ;;  %p1097_p12 = scmp.lt.s32.totalorder %s1090_s23, %s1626_s1 }
  0x2a   : > { %p1092_p7 = scmp.ne.s32.totalorder %s1090_s23, %s1091_s24  ;;  %p1098_p2 = scmp.lt.s32.totalorder %s1096_s17, %s1091_s24 }
  0x2c   : > { %p1094_p10 = pnand %p1093_p9, %p1092_p7  ;;  %p1099_p4 = por %p1098_p2, %p1097_p12 }
  0x2e   : > { %p1095_p11 = pneg %p1094_p10 }
  0x30   : > { %p1100_p1 = pnand %p1099_p4, %p1095_p11 }
  0x32   : > { %1103 = shalt.err (!%p1100_p1)
}
  0x33   : > { %977 = dma.hbm_to_vmem [thread:$0]  (!%p1429_p8), %s297_s14, 128, %s299_s13, %s1442_s16  }
  0x34   : > { %s1288_s3 = smov [#allocation10]   ;;  %s1627_s27 = smov 8  }
  0x35   : > { %s250_s22 = sshll.u32 %s1288_s3, 4  ;;  %s1628_s23 = smov 128   ;;  %s251_s22 = int_to_ptr.vmem [resolvable:$true] %s250_s22 }
  0x36   : > { %970 = dma.hbm_to_vmem [thread:$0]  (!%p1381_p6), %s249_s19, 512, %s251_s22, [#allocation9], %s1628_s23, %s1628_s23, %s1627_s27  }
  0x37   : > { %s275_s11 = scalar_lea.hbm %s1595_s0, %s1427_s29  ;;  %s271_s15 = scalar_lea.vmem [#allocation2], %s1424_s28 }
  0x38   : > { %s279_s17 = sshll.u32 %s271_s15, 4  ;;  %s277_s18 = sshll.u32 %s275_s11, 4  ;;  %s280_s17 = int_to_ptr.vmem [resolvable:$true] %s279_s17  ;;  %s278_s18 = int_to_ptr.hbm [resolvable:$true] %s277_s18 }
  0x39   : > { %s1629_s13 = sand.u32 1, %s1279_s26   ;;  %s1149_s1 = sshra.s32 %s278_s18, 4  ;;  %s1150_s1 = int_to_ptr.hbm [resolvable:$true] %s1149_s1 }
  0x3a   : > { %s268_s14 = scalar_lea.sflag [#allocation3], %s1629_s13  ;;  %s1151_s3 = scalar_lea.hbm %s1150_s1, 8 }
  0x3b   : > { %p1152_p1 = scmp.ne.s32.totalorder %s1150_s1, %s1151_s3  ;;  %s1156_s22 = scalar_lea.hbm %s1595_s0, 16 }
  0x3c   : > { %p1157_p6 = scmp.lt.s32.totalorder %s1150_s1, %s1595_s0  ;;  %p1158_p11 = scmp.lt.s32.totalorder %s1156_s22, %s1151_s3 }
  0x3d   : > { %p1154_p7 = pnand %p1152_p1, %p1093_p9 }
  0x3e   : > { %p1159_p12 = por %p1158_p11, %p1157_p6 }
  0x3f   : > { %p1155_p10 = pneg %p1154_p7 }
  0x41   : > { %p1160_p2 = pnand %p1159_p12, %p1155_p10 }
  0x43   : > { %1163 = shalt.err (!%p1160_p2)
}
  0x44   : > { %974 = dma.hbm_to_vmem [thread:$0]  (!%p1429_p8), %s278_s18, 128, %s280_s17, %s268_s14  }
  0x45   : > { %s313_s11 = scalar_lea.hbm %s1597_s2, %s1427_s29  ;;  %s309_s15 = scalar_lea.vmem [#allocation7], %s1424_s28 }
  0x46   : > { %s317_s13 = sshll.u32 %s309_s15, 4  ;;  %s315_s12 = sshll.u32 %s313_s11, 4  ;;  %s318_s13 = int_to_ptr.vmem [resolvable:$true] %s317_s13  ;;  %s316_s12 = int_to_ptr.hbm [resolvable:$true] %s315_s12 }
  0x47   : > { %s1179_s1 = sshra.s32 %s316_s12, 4  ;;  %s1186_s17 = scalar_lea.hbm %s1597_s2, 16  ;;  %s1180_s1 = int_to_ptr.hbm [resolvable:$true] %s1179_s1 }
  0x48   : > { %s1181_s3 = scalar_lea.hbm %s1180_s1, 8  ;;  %p1187_p10 = scmp.lt.s32.totalorder %s1180_s1, %s1597_s2 }
  0x49   : > { %p1182_p4 = scmp.ne.s32.totalorder %s1180_s1, %s1181_s3  ;;  %p1188_p6 = scmp.lt.s32.totalorder %s1186_s17, %s1181_s3 }
  0x4b   : > { %p1184_p1 = pnand %p1182_p4, %p1093_p9  ;;  %p1189_p11 = por %p1188_p6, %p1187_p10 }
  0x4d   : > { %p1185_p7 = pneg %p1184_p1 }
  0x4f   : > { %p1190_p12 = pnand %p1189_p11, %p1185_p7 }
  0x51   : > { %1193 = shalt.err (!%p1190_p12)
}
  0x52   : > { %980 = dma.hbm_to_vmem [thread:$0]  (!%p1429_p8), %s316_s12, 128, %s318_s13, %s1442_s16  }
  0x53   : > { %326 = sbr.rel (%p1372_p3) target bundleno = 1526 (0x5f6), region = 48  ;;  %s1501_s28 = sand.u32 (!%p1372_p3), 1, %s1275_s25  }
  0x54   : > { %s1504_s29 = sshll.u32 (!%p1372_p3), %s1501_s28, 3  ;;  %s329_s27 = scalar_lea.sflag (!%p1372_p3), [#allocation3], %s1501_s28 }
  0x55   : > { %s332_s23 = scalar_lea.vmem (!%p1372_p3), [#allocation2], %s1504_s29 }
  0x58   : > { %1254 = dma.done.wait (%p1408_p13), %s329_s27, 128  }
  0x59   : > { %1256 = vsyncadd (%p1408_p13), %s329_s27, 4294967168  ;;  %s338_s9 = sand.u32 1, %s1367_s8   ;;  %s342_s30 = scalar_lea.vmem [#allocation5], %s1504_s29 }
  0x5a   : > { %s339_s16 = scalar_lea.sflag [#allocation6], %s338_s9 }
  0x5b   : > { %1258 = dma.done.wait (%p1408_p13), %s339_s16, 256  }
  0x5c   : > { %1260 = vsyncadd (%p1408_p13), %s339_s16, 4294967040  ;;  %s352_s24 = scalar_lea.vmem [#allocation7], %s1504_s29  ;;  %p1630_p3 = scmp.eq.s32.totalorder %s1367_s8, 0 }
  0x5e   : > { %1262 = dma.done.wait (%p1630_p3), [#allocation9], 1024   ;;  %p1631_p8 = pmov %p1630_p3 }
  0x5f   : > { %v410_v0 = vld [vmem:[#allocation8 + $0x18] sm:$0xff]  ;;  %v409_v1 = vld [vmem:[#allocation8 + $0x10] sm:$0xff]  ;;  %v408_v2 = vld [vmem:[#allocation8 + $0x8] sm:$0xff]  ;;  %vm415_vm0 = vcmask 261120   ;;  %s1289_s11 = smov 120   ;;  %s1290_s15 = smov 96  }
  0x60   : > { %1264 = vsyncadd (%p1631_p8), [#allocation9], 4294966272  ;;  %437 = vmatpush.msra.mxu0 %v410_v0  ;;  %v407_v3 = vld [vmem:[#allocation8] sm:$0xff]  ;;  %v404_v4 = vld [vmem:[%s332_s23] sm:$0xff]  ;;  %s1291_s13 = smov 88   ;;  %s1292_s12 = smov 64  }
  0x61   : > { %v405_v5 = vld [vmem:[%s342_s30] sm:$0xff]  ;;  %v406_v6 = vld [vmem:[%s352_s24] sm:$0xff]  ;;  %vm454_vm1 = vcmask 64512   ;;  %s1293_s1 = smov 56   ;;  %s1294_s3 = smov 72   ;;  %vm726_vm2 = vcmask 130048  }
  0x62   : > { %438 = vmatpush.msra.mxu0 %v409_v1  ;;  %v1041_v7 = vld [vmem:[%s1599_s4] ss:$0 sm:$0xff]  ;;  %s1295_s19 = smov 80   ;;  %s1296_s22 = smov 112   ;;  %vm728_vm3 = vcmask 195584  }
  0x63   : > { %s1297_s17 = smov 104   ;;  %s1298_s18 = smov 40  }
  0x64   : > { %439 = vmatpush.msra.mxu0 %v408_v2  ;;  %s1299_s14 = smov 8   ;;  %s1300_s27 = smov 48  }
  0x65   : > { %s1301_s23 = smov 24   ;;  %s1302_s9 = smov 16  }
  0x66   : > { %440 = vmatpush.msra.mxu0 %v407_v3  ;;  %s945_s16 = sshll.u32 %s1367_s8, 3 }
  0x67   : > { %928 = vmatmul.msk.f32.vlgmr.msra.gmra.mxu0 %vm415_vm0, %v404_v4  ;;  %s773_s20 = scalar_lea.hbm %s1602_s7, %s945_s16 }
  0x6f   : > { %929 = vmatmul.msk.f32.gmra.mxu0 %vm415_vm0, %v405_v5  ;;  %v733_v5 = vld [vmem:[#allocation10 + $0x18] sm:$0xff] }
  0x77   : > { %930 = vmatmul.msk.f32.gmra.mxu0 %vm415_vm0, %v406_v6  ;;  %v732_v6 = vld [vmem:[#allocation10 + $0x10] sm:$0xff] }
  0xe4   : > { %v442_v8 = vpop.f32.mrf.mxu0 }
  0xe5   : > { %v443_v9 = vadd.f32 %v1041_v7, %v442_v8  ;;  %v730_v8 = vld [vmem:[#allocation10] sm:$0xff] }
  0xe7   : > { %518 = vrot.lane.b32.xlu1 %v443_v9, %s1289_s11 }
  0xec   : > { %v445_v10 = vpop.f32.mrf.mxu0 }
  0xed   : > { %v446_v11 = vadd.f32 %v1041_v7, %v445_v10 }
  0xef   : > { %452 = vrot.lane.b32.xlu0 %v446_v11, %s1290_s15  ;;  %s403_s15 = scalar_lea.vmem [#allocation11], %s1504_s29  ;;  %s1229_s29 = scalar_lea.hbm %s1602_s7, 16 }
  0xf4   : > { %v448_v12 = vpop.f32.mrf.mxu0 }
  0xf5   : > { %v1529_v13 = vadd.f32 %v1041_v7, %v448_v12  ;;  %v731_v7 = vld [vmem:[#allocation10 + $0x8] sm:$0xff] }
  0xf7   : > { %520 = vrot.lane.b32.xlu0 %v446_v11, %s1291_s13  ;;  %492 = vrot.lane.b32.xlu2 %v1529_v13, %s1292_s12  ;;  %s775_s13 = sshll.u32 %s403_s15, 4  ;;  %s777_s12 = sshll.u32 %s773_s20, 4  ;;  %s776_s13 = int_to_ptr.vmem [resolvable:$true] %s775_s13  ;;  %s778_s12 = int_to_ptr.hbm [resolvable:$true] %s777_s12 }
  0xf8   : > { %s1223_s8 = sshra.s32 %s778_s12, 4  ;;  %s1224_s8 = int_to_ptr.hbm [resolvable:$true] %s1223_s8 }
  0xf9   : > { %p1230_p4 = scmp.lt.s32.totalorder %s1224_s8, %s1602_s7 }
  0xff   : > { %557 = vrot.lane.b32.xlu2 %v1529_v13, %s1293_s1  ;;  %s763_s1 = scalar_lea.sflag [#allocation4], %s1501_s28 }
 0x151   : > { %v493_v19 = vpop.permute.xlu2 %492 }
 0x152   : > { %513 = vmatpush.msra.mxu2 %v493_v19 }
 0x159   : > { %v519_v16 = vpop.permute.xlu1 %518  ;;  %v558_v22 = vpop.permute.xlu2 %557 }
 0x15a   : > { %578 = vmatpush.msrb.mxu2 %v558_v22 }
 0x161   : > { %v453_v14 = vpop.permute.xlu0 %452 }
 0x162   : > { %931 = vmatpush.xpose.msk.msra.mxu1 %vm454_vm1, %v453_v14 }
 0x165   : > { %932 = vmatmul.msk.f32.vlgmr.msra.gmra.mxu1 %vm454_vm1, %v443_v9 }
 0x169   : > { %v521_v15 = vpop.permute.xlu0 %520 }
 0x16a   : > { %934 = vmatpush.xpose.msk.msra.mxu3 %vm454_vm1, %v521_v15  ;;  %v1042_v15 = vld [vmem:[%s1601_s6] ss:$0 sm:$0xff] }
 0x16d   : > { %935 = vmatmul.msk.f32.vlgmr.msra.gmra.mxu3 %vm454_vm1, %v519_v16 }
 0x1e2   : > { %v477_v17 = vpop.f32.mrf.mxu1 }
 0x1e3   : > { %v480_v18 = vsel %vm454_vm1, %v477_v17, -inf }
 0x1e4   : > { %481 = vmax.xlane.f32.xlu1 %v480_v18 }
 0x1f0   : > { %v543_v20 = vpop.f32.mrf.mxu3 }
 0x1f1   : > { %v546_v21 = vsel %vm454_vm1, %v543_v20, -inf }
 0x1f2   : > { %547 = vmax.xlane.f32.xlu2 %v546_v21 }
 0x1fd   : > { %650 = vrot.lane.b32.xlu1 %v446_v11, %s1294_s3  ;;  %s1225_s3 = scalar_lea.hbm %s1224_s8, 8 }
 0x1fe   : > { %p1226_p13 = scmp.ne.s32.totalorder %s1224_s8, %s1225_s3  ;;  %p1231_p1 = scmp.lt.s32.totalorder %s1229_s29, %s1225_s3 }
 0x200   : > { %p1227_p9 = pnand %p1226_p13, %p1412_p0  ;;  %p1232_p7 = por %p1231_p1, %p1230_p4 }
 0x202   : > { %p1228_p2 = pneg %p1227_p9 }
 0x204   : > { %p1233_p10 = pnand %p1232_p7, %p1228_p2 }
 0x20a   : > { %585 = vrot.lane.b32.xlu2 %v446_v11, %s1295_s19 }
 0x257   : > { %v482_v23 = vpop.xlane.xlu1 %481 }
 0x258   : > { %v483_v24 = vsub.f32 %v477_v17, %v482_v23 }
 0x25a   : > { %v484_v25 = vmul.f32 1.442695, %v483_v24 }
 0x25c   : > { %1043 = vpow2.f32 %v484_v25 }
 0x262   : > { %v1044_v26 = vpop.eup %1043 }
 0x263   : > { %v486_v27 = vsel %vm454_vm1, %v1044_v26, 0.0 }
 0x264   : > { %487 = vadd.xlane.f32.xlu2 %v486_v27 }
 0x265   : > { %v548_v28 = vpop.xlane.xlu2 %547 }
 0x266   : > { %v549_v29 = vsub.f32 %v543_v20, %v548_v28 }
 0x268   : > { %v550_v30 = vmul.f32 1.442695, %v549_v29 }
 0x26a   : > { %1045 = vpow2.f32 %v550_v30 }
 0x26d   : > { %v586_v31 = vpop.permute.xlu2 %585 }
 0x26e   : > { %937 = vmatpush.xpose.msk.msrb.mxu1 %vm454_vm1, %v586_v31 }
 0x26f   : > { %v651_v38 = vpop.permute.xlu1 %650 }
 0x270   : > { %v1046_v32 = vpop.eup %1045 }
 0x271   : > { %v552_v33 = vsel %vm454_vm1, %v1046_v32, 0.0 }
 0x272   : > { %553 = vadd.xlane.f32.xlu0 %v552_v33 }
 0x27c   : > { %583 = vrot.lane.b32.xlu2 %v443_v9, %s1296_s22 }
 0x286   : > { %648 = vrot.lane.b32.xlu0 %v443_v9, %s1297_s17 }
 0x2d7   : > { %v488_v34 = vpop.xlane.xlu2 %487 }
 0x2d8   : > { %1047 = vrcp.f32 %v488_v34 }
 0x2de   : > { %v1048_v35 = vpop.eup %1047 }
 0x2df   : > { %v584_v36 = vpop.permute.xlu2 %583  ;;  %v490_v37 = vmul.f32 %v1048_v35, %v1044_v26 }
 0x2e0   : > { %938 = vmatmul.msk.f32.vlgmr.msrb.gmra.mxu1 %vm454_vm1, %v584_v36 }
 0x2e1   : > { %933 = vmatmul.msk.f32.vlgmr.msra.gmra.mxu2 %vm454_vm1, %v490_v37 }
 0x2e2   : > { %940 = vmatpush.xpose.msk.msra.mxu2 %vm454_vm1, %v651_v38 }
 0x2e5   : > { %v554_v39 = vpop.xlane.xlu0 %553 }
 0x2e6   : > { %1049 = vrcp.f32 %v554_v39 }
 0x2ec   : > { %v1050_v40 = vpop.eup %1049 }
 0x2ed   : > { %v556_v41 = vmul.f32 %v1050_v40, %v1046_v32 }
 0x2ef   : > { %936 = vmatmul.msk.f32.vlgmr.msrb.gmra.mxu2 %vm454_vm1, %v556_v41 }
 0x2f8   : > { %v649_v42 = vpop.permute.xlu0 %648 }
 0x2f9   : > { %941 = vmatmul.msk.f32.vlgmr.msra.gmra.mxu2 %vm454_vm1, %v649_v42 }
 0x35d   : > { %v608_v43 = vpop.f32.mrf.mxu1 }
 0x35e   : > { %v611_v44 = vsel %vm454_vm1, %v608_v43, -inf }
 0x35f   : > { %612 = vmax.xlane.f32.xlu2 %v611_v44 }
 0x364   : > { %v515_v45 = vpop.f32.mrf.mxu2 }
 0x372   : > { %v580_v46 = vpop.f32.mrf.mxu2 }
 0x37c   : > { %v673_v47 = vpop.f32.mrf.mxu2 }
 0x37d   : > { %v676_v48 = vsel %vm454_vm1, %v673_v47, -inf }
 0x37e   : > { %677 = vmax.xlane.f32.xlu1 %v676_v48 }
 0x397   : > { %687 = vrot.lane.b32.xlu1 %v1529_v13, %s1298_s18 }
 0x3d2   : > { %v613_v49 = vpop.xlane.xlu2 %612 }
 0x3d3   : > { %v614_v50 = vsub.f32 %v608_v43, %v613_v49 }
 0x3d5   : > { %v615_v51 = vmul.f32 1.442695, %v614_v50 }
 0x3d7   : > { %1051 = vpow2.f32 %v615_v51 }
 0x3dd   : > { %v1052_v52 = vpop.eup %1051 }
 0x3de   : > { %v617_v53 = vsel %vm454_vm1, %v1052_v52, 0.0 }
 0x3df   : > { %618 = vadd.xlane.f32.xlu0 %v617_v53 }
 0x3f1   : > { %v678_v54 = vpop.xlane.xlu1 %677 }
 0x3f2   : > { %v679_v55 = vsub.f32 %v673_v47, %v678_v54 }
 0x3f3   : > { %714 = vrot.lane.b32.xlu0 %v580_v46, %s1299_s14 }
 0x3f4   : > { %v680_v56 = vmul.f32 1.442695, %v679_v55 }
 0x3f6   : > { %1053 = vpow2.f32 %v680_v56 }
 0x3fc   : > { %v1054_v57 = vpop.eup %1053 }
 0x3fd   : > { %v682_v58 = vsel %vm454_vm1, %v1054_v57, 0.0 }
 0x3fe   : > { %683 = vadd.xlane.f32.xlu2 %v682_v58 }
 0x409   : > { %v688_v59 = vpop.permute.xlu1 %687 }
 0x40a   : > { %708 = vmatpush.msra.mxu1 %v688_v59 }
 0x416   : > { %622 = vrot.lane.b32.xlu2 %v1529_v13, %s1300_s27 }
 0x452   : > { %v619_v60 = vpop.xlane.xlu0 %618 }
 0x453   : > { %1055 = vrcp.f32 %v619_v60 }
 0x459   : > { %v1056_v62 = vpop.eup %1055 }
 0x45a   : > { %v621_v2 = vmul.f32 %v1056_v62, %v1052_v52 }
 0x465   : > { %v715_v9 = vpop.permute.xlu0 %714 }
 0x466   : > { %v725_v11 = vsel %vm454_vm1, %v515_v45, %v715_v9 }
 0x471   : > { %v684_v61 = vpop.xlane.xlu2 %683 }
 0x472   : > { %1057 = vrcp.f32 %v684_v61 }
 0x478   : > { %v1058_v63 = vpop.eup %1057 }
 0x479   : > { %v686_v0 = vmul.f32 %v1058_v63, %v1054_v57  ;;  %v623_v1 = vpop.permute.xlu2 %622 }
 0x47a   : > { %643 = vmatpush.msrb.mxu3 %v623_v1 }
 0x47b   : > { %939 = vmatmul.msk.f32.vlgmr.msrb.gmra.mxu3 %vm454_vm1, %v621_v2  ;;  %942 = vmatmul.msk.f32.vlgmr.msra.gmra.mxu1 %vm454_vm1, %v686_v0 }
 0x47c   : > { %753 = vmatpush.msra.mxu3 %v733_v5 }
 0x47e   : > { %754 = vmatpush.msra.mxu3 %v732_v6 }
 0x480   : > { %755 = vmatpush.msra.mxu3 %v731_v7 }
 0x482   : > { %756 = vmatpush.msra.mxu3 %v730_v8 }
 0x4f8   : > { %v710_v3 = vpop.f32.mrf.mxu1 }
 0x4f9   : > { %722 = vrot.lane.b32.xlu0 %v710_v3, %s1301_s23 }
 0x4fe   : > { %v645_v4 = vpop.f32.mrf.mxu3 }
 0x4ff   : > { %718 = vrot.lane.b32.xlu2 %v645_v4, %s1302_s9 }
 0x559   : > { %v719_v10 = vpop.permute.xlu2 %718 }
 0x55a   : > { %v727_v12 = vsel %vm726_vm2, %v725_v11, %v719_v10 }
 0x56b   : > { %v723_v13 = vpop.permute.xlu0 %722 }
 0x56c   : > { %v729_v14 = vsel %vm728_vm3, %v727_v12, %v723_v13 }
 0x56d   : > { %943 = vmatmul.msk.f32.vlgmr.msra.gmra.mxu3 %vm415_vm0, %v729_v14 }
 0x5f0   : > { %v758_v16 = vpop.f32.mrf.mxu3 }
 0x5f1   : > { %v759_v17 = vadd.f32 %v1042_v15, %v758_v16 }
 0x5f3   : > { %761 = vst.msk [vmem:[%s403_s15] sm:$0xff] %vm415_vm0, %v759_v17 }
 0x5f4   : > { %1236 = shalt.err (!%p1233_p10)
}
 0x5f5   : > { %962 = dma.vmem_to_hbm [thread:$0]  (%p1412_p0), %s776_s13, 128, %s778_s12, %s763_s1  }
 0x5f6 PF: > { %s1632_s28 = sld [smem:[#allocation16_spill]] }
 0x5f7   : > { %s1634_s27 = sld [smem:[#allocation17_spill]] }
 0x5fc   : > { %s789_s23 = sand.u32 1, %s1632_s28  }
 0x5fd   : > { %p1635_p6 = scmp.ge.s32.totalorder %s1634_s27, 2  ;;  %s790_s9 = scalar_lea.sflag [#allocation4], %s789_s23 }
 0x5ff   : > { %p982_p11 = pnand %p1635_p6, %p1418_p5 }
 0x601   : > { %p983_p12 = pneg %p982_p11 }
 0x603   : > { %1266 = dma.done.wait (%p983_p12), %s790_s9, 128  }
 0x604   : > { %1268 = vsyncadd (%p983_p12), %s790_s9, 4294967168  ;;  %s1636_s27 = sld [smem:[#allocation18_spill]]  ;;  %s1638_s24 = smov %s1275_s25 }
 0x605   : > { %s1637_s16 = sld [smem:[#allocation19_spill]]  ;;  %s1639_s25 = smov %s1279_s26 }
 0x60a   : > { %p24_p3 = scmp.ge.s32.totalorder %s1636_s27, 4  }
 0x60b   : > { %s1640_s26 = smov %s1637_s16 }
 0x60c   :  { %26 = sbr.rel (!%p24_p3) target bundleno = 11 (0xb), region = 125 }
 0x611   :  { %796 = vsyncpa [#allocation3], 1 }
 0x612   :  { %798 = vsyncpa [#allocation3 + $0x1], 1 }
 0x613   :  { %799 = vsyncpa [#allocation6], 1 }
 0x614   :  { %801 = vsyncpa [#allocation6 + $0x1], 1 }
 0x615   :  { %802 = vsyncpa [#allocation9], 1 }
 0x616   :  { %803 = vsyncpa [#allocation4], 1 }
 0x617   :  { %805 = vsyncpa [#allocation4 + $0x1], 1 }

</bundles_post_ra>
